<compile_context>
chip_gen: v7x
topology: tpu7x:2x2x1
jax: 0.10.0
libtpu: 0.0.40
codegen_flags: <defaults>
</compile_context>

<pallas_src>
import functools

import jax
import jax.numpy as jnp
from jax import lax
from jax.experimental import pallas as pl
from jax.experimental.pallas import tpu as pltpu


def _round_up(x: int, m: int) -> int:
    return (x + m - 1) // m * m


def _topk_stream_kernel(q_ref, vt_ref, scores_ref, idx_ref,
                        run_vals, run_idx, *, k: int, n_valid: int,
                        tile_n: int):
    """One (batch-block, n-tile) step of the streaming dot-product top-k.

    q_ref:      (TB, H)      query block (resident across the N axis)
    vt_ref:     (H, TILE_N)  lane-dense slice of the transposed vector bank
    scores_ref: (TB, k)      top-k scores output (written on the last N step)
    idx_ref:    (TB, k)      top-k indices output (int32, last N step)
    run_vals:   (TB, k) f32  running top-k values   (VMEM scratch)
    run_idx:    (TB, k) i32  running top-k indices  (VMEM scratch)
    """
    n = pl.program_id(1)
    n_steps = pl.num_programs(1)

    neg_inf = jnp.float32(-jnp.inf)
    big_idx = jnp.int32(2 ** 30)   # sentinel: larger than any valid index

    @pl.when(n == 0)
    def _init():
        run_vals[...] = jnp.full_like(run_vals, neg_inf)
        run_idx[...] = jnp.full_like(run_idx, big_idx)

    # ---- MXU: scores for this tile, N on the lane axis, f32 accumulation. ----
    # (TB, H) @ (H, TILE_N) -> (TB, TILE_N); no RHS transpose needed.
    scores = lax.dot_general(
        q_ref[...], vt_ref[...],
        dimension_numbers=(((1,), (0,)), ((), ())),
        preferred_element_type=jnp.float32,
        precision=lax.Precision.HIGHEST,
    )
    tb = scores.shape[0]

    # Lane ids within this tile (hoisted out of the k-loop) + global offset.
    lane = lax.broadcasted_iota(jnp.int32, (tb, tile_n), 1)
    offset = n * tile_n
    scores = jnp.where((lane + offset) < n_valid, scores, neg_inf)  # mask pad

    # ---- Per-tile top-k: k iterative argmax passes over TILE_N lanes. ----
    tile_vals = []
    tile_idx = []
    for _ in range(k):
        m = jnp.max(scores, axis=1, keepdims=True)                    # (TB, 1)
        pos = jnp.min(jnp.where(scores == m, lane, tile_n),
                      axis=1, keepdims=True)                          # (TB, 1)
        tile_vals.append(m)
        tile_idx.append(pos + offset)
        scores = jnp.where(lane == pos, neg_inf, scores)
    tile_vals = jnp.concatenate(tile_vals, axis=1)                    # (TB, k)
    tile_idx = jnp.concatenate(tile_idx, axis=1).astype(jnp.int32)    # (TB, k)

    # ---- Merge 2k candidates (running + tile) into the running top-k. ----
    # Global indices are unique across running/tile candidates, so selecting
    # the max value with min-index tie-break and masking by index is exact.
    cand_vals = jnp.concatenate([run_vals[...], tile_vals], axis=1)   # (TB, 2k)
    cand_idx = jnp.concatenate([run_idx[...], tile_idx], axis=1)      # (TB, 2k)
    new_vals = []
    new_idx = []
    for _ in range(k):
        m = jnp.max(cand_vals, axis=1, keepdims=True)
        sel = jnp.min(jnp.where(cand_vals == m, cand_idx, big_idx),
                      axis=1, keepdims=True)
        new_vals.append(m)
        new_idx.append(sel)
        cand_vals = jnp.where(cand_idx == sel, neg_inf, cand_vals)
    run_vals[...] = jnp.concatenate(new_vals, axis=1)
    run_idx[...] = jnp.concatenate(new_idx, axis=1)

    # ---- Finalize: write sorted (descending) top-k for this batch block. ----
    @pl.when(n == n_steps - 1)
    def _finalize():
        scores_ref[...] = run_vals[...].astype(scores_ref.dtype)
        idx_ref[...] = run_idx[...]


def torch_index_forward(query: jax.Array, vectors: jax.Array, k: int,
                        *, tile_n: int = 1024):
    """JAX/Pallas equivalent of TorchIndex.forward({'query': query, 'k': k}).

    query:   (B, H) queries.
    vectors: (N, H) registered vector bank.
    Returns (scores (B, k) float32, indices (B, k) int32), sorted descending.
    """
    B, H = query.shape
    N, Hv = vectors.shape
    assert H == Hv, "query / vector dimension mismatch"
    k = min(int(k), N)
    assert k >= 1

    # Lane-dense bank layout: (H, N) puts N on the lane axis.  In a production
    # index this transpose would be done once at .add() time, not per query.
    vectors_t = jnp.transpose(vectors, (1, 0))

    # N tile: multiple of 256 fills the 256-wide MXU on v6e/v7x (and is a
    # multiple of 128 for v5e lane tiling).  Batch padded to the 8-row sublane.
    tile_n = max(128, _round_up(min(tile_n, _round_up(N, 128)), 128))
    if tile_n < k:
        tile_n = _round_up(k, 128)
    tile_b = min(128, _round_up(B, 8))

    n_pad = _round_up(N, tile_n)
    b_pad = _round_up(B, tile_b)

    q_p = query if b_pad == B else jnp.pad(query, ((0, b_pad - B), (0, 0)))
    v_p = vectors_t if n_pad == N else jnp.pad(vectors_t,
                                               ((0, 0), (0, n_pad - N)))

    grid = (b_pad // tile_b, n_pad // tile_n)
    kernel = functools.partial(_topk_stream_kernel, k=k, n_valid=N,
                               tile_n=tile_n)

    scores, indices = pl.pallas_call(
        kernel,
        out_shape=(
            jax.ShapeDtypeStruct((b_pad, k), jnp.float32),
            jax.ShapeDtypeStruct((b_pad, k), jnp.int32),
        ),
        grid_spec=pltpu.PrefetchScalarGridSpec(
            num_scalar_prefetch=0,
            grid=grid,
            in_specs=[
                # Query block stays resident while the N axis iterates.
                pl.BlockSpec((tile_b, H), lambda i, n: (i, 0)),
                # Vector-bank tile, double-buffered HBM->VMEM by Pallas.
                pl.BlockSpec((H, tile_n), lambda i, n: (0, n)),
            ],
            out_specs=(
                pl.BlockSpec((tile_b, k), lambda i, n: (i, 0)),
                pl.BlockSpec((tile_b, k), lambda i, n: (i, 0)),
            ),
            scratch_shapes=[
                pltpu.VMEM((tile_b, k), jnp.float32),   # running top-k values
                pltpu.VMEM((tile_b, k), jnp.int32),     # running top-k indices
            ],
        ),
        compiler_params=pltpu.CompilerParams(
            dimension_semantics=("parallel", "arbitrary"),
            # Explicit budget; fits comfortably on v7x's 64 MiB VMEM too.
            vmem_limit_bytes=48 * 1024 * 1024,
        ),
    )(q_p, v_p)

    return scores[:B], indices[:B]


if __name__ == "__main__":
    key = jax.random.PRNGKey(0)
    kq, kv = jax.random.split(key)

    # Small shapes; N spans several 128-wide tiles including a ragged last one.
    B, H, N, K = 2, 32, 300, 4

    vectors = jax.random.normal(kv, (N, H), dtype=jnp.float32)  # the bank
    query = jax.random.normal(kq, (B, H), dtype=jnp.float32)

    # tile_n=128 here so the tiny example exercises the streaming merge path.
    scores, indices = torch_index_forward(query, vectors, K, tile_n=128)
    jax.block_until_ready((scores, indices))

    # Reference check against plain JAX (einsum + top_k).
    ref_scores_full = jnp.einsum("bh,nh->bn", query, vectors,
                                 precision=lax.Precision.HIGHEST)
    ref_scores, ref_idx = lax.top_k(ref_scores_full, K)
    assert scores.shape == (B, K) and indices.shape == (B, K)
    assert jnp.allclose(scores, ref_scores, atol=1e-5, rtol=1e-5)
    assert jnp.array_equal(indices, ref_idx.astype(jnp.int32))

    print("KERNEL_OK")
</pallas_src>

<mosaic_0001>
module attributes {stable_mosaic.version = 11 : i64} {
  func.func @_topk_stream_kernel(%arg0: i32, %arg1: i32, %arg2: memref<8x32xf32, #tpu.memory_space<vmem>>, %arg3: memref<32x128xf32, #tpu.memory_space<vmem>>, %arg4: memref<8x4xf32, #tpu.memory_space<vmem>>, %arg5: memref<8x4xi32, #tpu.memory_space<vmem>>, %arg6: memref<8x4xf32, #tpu.memory_space<vmem>>, %arg7: memref<8x4xi32, #tpu.memory_space<vmem>>) attributes {dimension_semantics = [#tpu.dimension_semantics<parallel>, #tpu.dimension_semantics<arbitrary>], iteration_bounds = array<i64: 1, 3>, scalar_prefetch = 0 : i64, scratch_operands = 2 : i64, tpu.core_type = #tpu.core_type<tc>, window_params = [{transform_indices = @transform_0, window_bounds = array<i64: 8, 32>}, {transform_indices = @transform_1, window_bounds = array<i64: 32, 128>}, {transform_indices = @transform_2, window_bounds = array<i64: 8, 4>}, {transform_indices = @transform_3, window_bounds = array<i64: 8, 4>}]} {
    %c0_i32 = arith.constant 0 : i32
    %0 = arith.cmpi eq, %arg1, %c0_i32 : i32
    %1 = arith.extui %0 : i1 to i32
    %cst = arith.constant 0xFF800000 : f32
    %c1073741824_i32 = arith.constant 1073741824 : i32
    %c0_i32_0 = arith.constant 0 : i32
    %2 = arith.cmpi ne, %1, %c0_i32_0 : i32
    scf.if %2 {
      %123 = vector.broadcast %cst : f32 to vector<8x4xf32>
      %c0_45 = arith.constant 0 : index
      %c0_46 = arith.constant 0 : index
      %124 = vector.load %arg6[%c0_45, %c0_46] : memref<8x4xf32, #tpu.memory_space<vmem>>, vector<8x4xf32>
      tpu.vector_store %arg6[%c0_45, %c0_46], %123 {strides = array<i32>} : memref<8x4xf32, #tpu.memory_space<vmem>>, vector<8x4xf32>,
      %125 = vector.broadcast %c1073741824_i32 : i32 to vector<8x4xi32>
      %c0_47 = arith.constant 0 : index
      %c0_48 = arith.constant 0 : index
      %126 = vector.load %arg7[%c0_47, %c0_48] : memref<8x4xi32, #tpu.memory_space<vmem>>, vector<8x4xi32>
      tpu.vector_store %arg7[%c0_47, %c0_48], %125 {strides = array<i32>} : memref<8x4xi32, #tpu.memory_space<vmem>>, vector<8x4xi32>,
    } else {
    }
    %c0 = arith.constant 0 : index
    %c0_1 = arith.constant 0 : index
    %3 = vector.load %arg2[%c0, %c0_1] : memref<8x32xf32, #tpu.memory_space<vmem>>, vector<8x32xf32>
    %c0_2 = arith.constant 0 : index
    %c0_3 = arith.constant 0 : index
    %4 = vector.load %arg3[%c0_2, %c0_3] : memref<32x128xf32, #tpu.memory_space<vmem>>, vector<32x128xf32>
    %cst_4 = arith.constant dense<0.000000e+00> : vector<8x128xf32>
    %5 = tpu.matmul %3, %4, %cst_4 {dimension_numbers = #tpu.dot_dimension_numbers<[1], [0], [0], [1], [0, 0, 1, 1], [], []>, precision = #tpu.contract_precision<fp32>} : vector<8x32xf32>, vector<32x128xf32>, vector<8x128xf32> -> vector<8x128xf32>
    %6 = tpu.iota {dimensions = array<i32: 1>} : vector<8x128xi32>
    %c128_i32 = arith.constant 128 : i32
    %7 = arith.muli %arg1, %c128_i32 : i32
    %8 = vector.broadcast %7 : i32 to vector<8x128xi32>
    %9 = arith.addi %6, %8 : vector<8x128xi32>
    %c300_i32 = arith.constant 300 : i32
    %10 = vector.broadcast %c300_i32 : i32 to vector<8x128xi32>
    %11 = arith.cmpi slt, %9, %10 : vector<8x128xi32>
    %cst_5 = arith.constant 0xFF800000 : f32
    %12 = vector.broadcast %cst_5 : f32 to vector<8x128xf32>
    %13 = arith.select %11, %5, %12 : vector<8x128xi1>, vector<8x128xf32>
    %cst_6 = arith.constant dense<0xFF800000> : vector<8xf32>
    %14 = vector.multi_reduction <maximumf>, %13, %cst_6 [1] : vector<8x128xf32> to vector<8xf32>
    %15 = vector.shape_cast %14 : vector<8xf32> to vector<8x1xf32>
    %16 = vector.broadcast %15 : vector<8x1xf32> to vector<8x128xf32>
    %17 = arith.cmpf oeq, %13, %16 : vector<8x128xf32>
    %c128_i32_7 = arith.constant 128 : i32
    %18 = vector.broadcast %c128_i32_7 : i32 to vector<8x128xi32>
    %19 = arith.select %17, %6, %18 : vector<8x128xi1>, vector<8x128xi32>
    %cst_8 = arith.constant dense<2147483647> : vector<8xi32>
    %20 = vector.multi_reduction <minsi>, %19, %cst_8 [1] : vector<8x128xi32> to vector<8xi32>
    %21 = vector.shape_cast %20 : vector<8xi32> to vector<8x1xi32>
    %22 = vector.broadcast %7 : i32 to vector<8x1xi32>
    %23 = arith.addi %21, %22 : vector<8x1xi32>
    %24 = vector.broadcast %21 : vector<8x1xi32> to vector<8x128xi32>
    %25 = arith.cmpi eq, %6, %24 : vector<8x128xi32>
    %cst_9 = arith.constant 0xFF800000 : f32
    %26 = vector.broadcast %cst_9 : f32 to vector<8x128xf32>
    %27 = arith.select %25, %26, %13 : vector<8x128xi1>, vector<8x128xf32>
    %cst_10 = arith.constant dense<0xFF800000> : vector<8xf32>
    %28 = vector.multi_reduction <maximumf>, %27, %cst_10 [1] : vector<8x128xf32> to vector<8xf32>
    %29 = vector.shape_cast %28 : vector<8xf32> to vector<8x1xf32>
    %30 = vector.broadcast %29 : vector<8x1xf32> to vector<8x128xf32>
    %31 = arith.cmpf oeq, %27, %30 : vector<8x128xf32>
    %c128_i32_11 = arith.constant 128 : i32
    %32 = vector.broadcast %c128_i32_11 : i32 to vector<8x128xi32>
    %33 = arith.select %31, %6, %32 : vector<8x128xi1>, vector<8x128xi32>
    %cst_12 = arith.constant dense<2147483647> : vector<8xi32>
    %34 = vector.multi_reduction <minsi>, %33, %cst_12 [1] : vector<8x128xi32> to vector<8xi32>
    %35 = vector.shape_cast %34 : vector<8xi32> to vector<8x1xi32>
    %36 = vector.broadcast %7 : i32 to vector<8x1xi32>
    %37 = arith.addi %35, %36 : vector<8x1xi32>
    %38 = vector.broadcast %35 : vector<8x1xi32> to vector<8x128xi32>
    %39 = arith.cmpi eq, %6, %38 : vector<8x128xi32>
    %cst_13 = arith.constant 0xFF800000 : f32
    %40 = vector.broadcast %cst_13 : f32 to vector<8x128xf32>
    %41 = arith.select %39, %40, %27 : vector<8x128xi1>, vector<8x128xf32>
    %cst_14 = arith.constant dense<0xFF800000> : vector<8xf32>
    %42 = vector.multi_reduction <maximumf>, %41, %cst_14 [1] : vector<8x128xf32> to vector<8xf32>
    %43 = vector.shape_cast %42 : vector<8xf32> to vector<8x1xf32>
    %44 = vector.broadcast %43 : vector<8x1xf32> to vector<8x128xf32>
    %45 = arith.cmpf oeq, %41, %44 : vector<8x128xf32>
    %c128_i32_15 = arith.constant 128 : i32
    %46 = vector.broadcast %c128_i32_15 : i32 to vector<8x128xi32>
    %47 = arith.select %45, %6, %46 : vector<8x128xi1>, vector<8x128xi32>
    %cst_16 = arith.constant dense<2147483647> : vector<8xi32>
    %48 = vector.multi_reduction <minsi>, %47, %cst_16 [1] : vector<8x128xi32> to vector<8xi32>
    %49 = vector.shape_cast %48 : vector<8xi32> to vector<8x1xi32>
    %50 = vector.broadcast %7 : i32 to vector<8x1xi32>
    %51 = arith.addi %49, %50 : vector<8x1xi32>
    %52 = vector.broadcast %49 : vector<8x1xi32> to vector<8x128xi32>
    %53 = arith.cmpi eq, %6, %52 : vector<8x128xi32>
    %cst_17 = arith.constant 0xFF800000 : f32
    %54 = vector.broadcast %cst_17 : f32 to vector<8x128xf32>
    %55 = arith.select %53, %54, %41 : vector<8x128xi1>, vector<8x128xf32>
    %cst_18 = arith.constant dense<0xFF800000> : vector<8xf32>
    %56 = vector.multi_reduction <maximumf>, %55, %cst_18 [1] : vector<8x128xf32> to vector<8xf32>
    %57 = vector.shape_cast %56 : vector<8xf32> to vector<8x1xf32>
    %58 = vector.broadcast %57 : vector<8x1xf32> to vector<8x128xf32>
    %59 = arith.cmpf oeq, %55, %58 : vector<8x128xf32>
    %c128_i32_19 = arith.constant 128 : i32
    %60 = vector.broadcast %c128_i32_19 : i32 to vector<8x128xi32>
    %61 = arith.select %59, %6, %60 : vector<8x128xi1>, vector<8x128xi32>
    %cst_20 = arith.constant dense<2147483647> : vector<8xi32>
    %62 = vector.multi_reduction <minsi>, %61, %cst_20 [1] : vector<8x128xi32> to vector<8xi32>
    %63 = vector.shape_cast %62 : vector<8xi32> to vector<8x1xi32>
    %64 = vector.broadcast %7 : i32 to vector<8x1xi32>
    %65 = arith.addi %63, %64 : vector<8x1xi32>
    %66 = tpu.concatenate %15, %29, %43, %57 in 1 : vector<8x1xf32>, vector<8x1xf32>, vector<8x1xf32>, vector<8x1xf32> -> vector<8x4xf32>
    %67 = tpu.concatenate %23, %37, %51, %65 in 1 : vector<8x1xi32>, vector<8x1xi32>, vector<8x1xi32>, vector<8x1xi32> -> vector<8x4xi32>
    %c0_21 = arith.constant 0 : index
    %c0_22 = arith.constant 0 : index
    %68 = vector.load %arg6[%c0_21, %c0_22] : memref<8x4xf32, #tpu.memory_space<vmem>>, vector<8x4xf32>
    %69 = tpu.concatenate %68, %66 in 1 : vector<8x4xf32>, vector<8x4xf32> -> vector<8x8xf32>
    %c0_23 = arith.constant 0 : index
    %c0_24 = arith.constant 0 : index
    %70 = vector.load %arg7[%c0_23, %c0_24] : memref<8x4xi32, #tpu.memory_space<vmem>>, vector<8x4xi32>
    %71 = tpu.concatenate %70, %67 in 1 : vector<8x4xi32>, vector<8x4xi32> -> vector<8x8xi32>
    %cst_25 = arith.constant dense<0xFF800000> : vector<8xf32>
    %72 = vector.multi_reduction <maximumf>, %69, %cst_25 [1] : vector<8x8xf32> to vector<8xf32>
    %73 = vector.shape_cast %72 : vector<8xf32> to vector<8x1xf32>
    %74 = vector.broadcast %73 : vector<8x1xf32> to vector<8x8xf32>
    %75 = arith.cmpf oeq, %69, %74 : vector<8x8xf32>
    %c1073741824_i32_26 = arith.constant 1073741824 : i32
    %76 = vector.broadcast %c1073741824_i32_26 : i32 to vector<8x8xi32>
    %77 = arith.select %75, %71, %76 : vector<8x8xi1>, vector<8x8xi32>
    %cst_27 = arith.constant dense<2147483647> : vector<8xi32>
    %78 = vector.multi_reduction <minsi>, %77, %cst_27 [1] : vector<8x8xi32> to vector<8xi32>
    %79 = vector.shape_cast %78 : vector<8xi32> to vector<8x1xi32>
    %80 = vector.broadcast %79 : vector<8x1xi32> to vector<8x8xi32>
    %81 = arith.cmpi eq, %71, %80 : vector<8x8xi32>
    %cst_28 = arith.constant 0xFF800000 : f32
    %82 = vector.broadcast %cst_28 : f32 to vector<8x8xf32>
    %83 = arith.select %81, %82, %69 : vector<8x8xi1>, vector<8x8xf32>
    %cst_29 = arith.constant dense<0xFF800000> : vector<8xf32>
    %84 = vector.multi_reduction <maximumf>, %83, %cst_29 [1] : vector<8x8xf32> to vector<8xf32>
    %85 = vector.shape_cast %84 : vector<8xf32> to vector<8x1xf32>
    %86 = vector.broadcast %85 : vector<8x1xf32> to vector<8x8xf32>
    %87 = arith.cmpf oeq, %83, %86 : vector<8x8xf32>
    %c1073741824_i32_30 = arith.constant 1073741824 : i32
    %88 = vector.broadcast %c1073741824_i32_30 : i32 to vector<8x8xi32>
    %89 = arith.select %87, %71, %88 : vector<8x8xi1>, vector<8x8xi32>
    %cst_31 = arith.constant dense<2147483647> : vector<8xi32>
    %90 = vector.multi_reduction <minsi>, %89, %cst_31 [1] : vector<8x8xi32> to vector<8xi32>
    %91 = vector.shape_cast %90 : vector<8xi32> to vector<8x1xi32>
    %92 = vector.broadcast %91 : vector<8x1xi32> to vector<8x8xi32>
    %93 = arith.cmpi eq, %71, %92 : vector<8x8xi32>
    %cst_32 = arith.constant 0xFF800000 : f32
    %94 = vector.broadcast %cst_32 : f32 to vector<8x8xf32>
    %95 = arith.select %93, %94, %83 : vector<8x8xi1>, vector<8x8xf32>
    %cst_33 = arith.constant dense<0xFF800000> : vector<8xf32>
    %96 = vector.multi_reduction <maximumf>, %95, %cst_33 [1] : vector<8x8xf32> to vector<8xf32>
    %97 = vector.shape_cast %96 : vector<8xf32> to vector<8x1xf32>
    %98 = vector.broadcast %97 : vector<8x1xf32> to vector<8x8xf32>
    %99 = arith.cmpf oeq, %95, %98 : vector<8x8xf32>
    %c1073741824_i32_34 = arith.constant 1073741824 : i32
    %100 = vector.broadcast %c1073741824_i32_34 : i32 to vector<8x8xi32>
    %101 = arith.select %99, %71, %100 : vector<8x8xi1>, vector<8x8xi32>
    %cst_35 = arith.constant dense<2147483647> : vector<8xi32>
    %102 = vector.multi_reduction <minsi>, %101, %cst_35 [1] : vector<8x8xi32> to vector<8xi32>
    %103 = vector.shape_cast %102 : vector<8xi32> to vector<8x1xi32>
    %104 = vector.broadcast %103 : vector<8x1xi32> to vector<8x8xi32>
    %105 = arith.cmpi eq, %71, %104 : vector<8x8xi32>
    %cst_36 = arith.constant 0xFF800000 : f32
    %106 = vector.broadcast %cst_36 : f32 to vector<8x8xf32>
    %107 = arith.select %105, %106, %95 : vector<8x8xi1>, vector<8x8xf32>
    %cst_37 = arith.constant dense<0xFF800000> : vector<8xf32>
    %108 = vector.multi_reduction <maximumf>, %107, %cst_37 [1] : vector<8x8xf32> to vector<8xf32>
    %109 = vector.shape_cast %108 : vector<8xf32> to vector<8x1xf32>
    %110 = vector.broadcast %109 : vector<8x1xf32> to vector<8x8xf32>
    %111 = arith.cmpf oeq, %107, %110 : vector<8x8xf32>
    %c1073741824_i32_38 = arith.constant 1073741824 : i32
    %112 = vector.broadcast %c1073741824_i32_38 : i32 to vector<8x8xi32>
    %113 = arith.select %111, %71, %112 : vector<8x8xi1>, vector<8x8xi32>
    %cst_39 = arith.constant dense<2147483647> : vector<8xi32>
    %114 = vector.multi_reduction <minsi>, %113, %cst_39 [1] : vector<8x8xi32> to vector<8xi32>
    %115 = vector.shape_cast %114 : vector<8xi32> to vector<8x1xi32>
    %116 = tpu.concatenate %73, %85, %97, %109 in 1 : vector<8x1xf32>, vector<8x1xf32>, vector<8x1xf32>, vector<8x1xf32> -> vector<8x4xf32>
    %c0_40 = arith.constant 0 : index
    %c0_41 = arith.constant 0 : index
    %117 = vector.load %arg6[%c0_40, %c0_41] : memref<8x4xf32, #tpu.memory_space<vmem>>, vector<8x4xf32>
    tpu.vector_store %arg6[%c0_40, %c0_41], %116 {strides = array<i32>} : memref<8x4xf32, #tpu.memory_space<vmem>>, vector<8x4xf32>,
    %118 = tpu.concatenate %79, %91, %103, %115 in 1 : vector<8x1xi32>, vector<8x1xi32>, vector<8x1xi32>, vector<8x1xi32> -> vector<8x4xi32>
    %c0_42 = arith.constant 0 : index
    %c0_43 = arith.constant 0 : index
    %119 = vector.load %arg7[%c0_42, %c0_43] : memref<8x4xi32, #tpu.memory_space<vmem>>, vector<8x4xi32>
    tpu.vector_store %arg7[%c0_42, %c0_43], %118 {strides = array<i32>} : memref<8x4xi32, #tpu.memory_space<vmem>>, vector<8x4xi32>,
    %c2_i32 = arith.constant 2 : i32
    %120 = arith.cmpi eq, %arg1, %c2_i32 : i32
    %121 = arith.extui %120 : i1 to i32
    %c0_i32_44 = arith.constant 0 : i32
    %122 = arith.cmpi ne, %121, %c0_i32_44 : i32
    scf.if %122 {
      %c0_45 = arith.constant 0 : index
      %c0_46 = arith.constant 0 : index
      %123 = vector.load %arg6[%c0_45, %c0_46] : memref<8x4xf32, #tpu.memory_space<vmem>>, vector<8x4xf32>
      %c0_47 = arith.constant 0 : index
      %c0_48 = arith.constant 0 : index
      %124 = vector.load %arg4[%c0_47, %c0_48] : memref<8x4xf32, #tpu.memory_space<vmem>>, vector<8x4xf32>
      tpu.vector_store %arg4[%c0_47, %c0_48], %123 {strides = array<i32>} : memref<8x4xf32, #tpu.memory_space<vmem>>, vector<8x4xf32>,
      %c0_49 = arith.constant 0 : index
      %c0_50 = arith.constant 0 : index
      %125 = vector.load %arg7[%c0_49, %c0_50] : memref<8x4xi32, #tpu.memory_space<vmem>>, vector<8x4xi32>
      %c0_51 = arith.constant 0 : index
      %c0_52 = arith.constant 0 : index
      %126 = vector.load %arg5[%c0_51, %c0_52] : memref<8x4xi32, #tpu.memory_space<vmem>>, vector<8x4xi32>
      tpu.vector_store %arg5[%c0_51, %c0_52], %125 {strides = array<i32>} : memref<8x4xi32, #tpu.memory_space<vmem>>, vector<8x4xi32>,
    } else {
    }
    return
  }
  func.func @transform_0(%arg0: i32, %arg1: i32) -> (i32, i32) {
    %c0_i32 = arith.constant 0 : i32
    %c0_i32_0 = arith.constant 0 : i32
    return %arg0, %c0_i32 : i32, i32
  }
  func.func @transform_1(%arg0: i32, %arg1: i32) -> (i32, i32) {
    %c0_i32 = arith.constant 0 : i32
    %c0_i32_0 = arith.constant 0 : i32
    return %c0_i32, %arg1 : i32, i32
  }
  func.func @transform_2(%arg0: i32, %arg1: i32) -> (i32, i32) {
    %c0_i32 = arith.constant 0 : i32
    %c0_i32_0 = arith.constant 0 : i32
    return %arg0, %c0_i32 : i32, i32
  }
  func.func @transform_3(%arg0: i32, %arg1: i32) -> (i32, i32) {
    %c0_i32 = arith.constant 0 : i32
    %c0_i32_0 = arith.constant 0 : i32
    return %arg0, %c0_i32 : i32, i32
  }
}

</mosaic_0001>

<bundles_post_ra>
// kernel: tpu_custom_call.1
= control target key start
LH: loop header
LB: loop body
LE: loop exit
PB: predicated region body
PF: predicated region fallthrough
CT: control target
= control target key end

     0   :  { %9 = vsyncpa [#allocation5], 0  ;;  %s1679_s0 = inlined_call_operand.hbm [shape: f32[8,32], index: 0, kind: input, shape index: {}]   ;;  %s1680_s1 = inlined_call_operand.hbm [shape: f32[32,384], index: 1, kind: input, shape index: {}]   ;;  %s1681_s2 = inlined_call_operand.vmem [shape: f32[8,4], index: 2, kind: output, shape index: {0}]   ;;  %s1682_s3 = inlined_call_operand.vmem [shape: s32[8,4], index: 3, kind: output, shape index: {1}]  }
   0x1   :  { %10 = vsyncpa [#allocation7], 0 }
   0x2   :  { %12 = vsyncpa [#allocation7 + $0x1], 0  ;;  %s1433_s12 = smov 0   ;;  %s1435_s13 = smov 0  }
   0x3   :  { %s1437_s14 = smov 0   ;;  %s1439_s15 = smov 0  }
   0x4   :  { %s1441_s16 = smov 0   ;;  %s1443_s17 = smov 0  }
   0x5 LB: > { %s1056_s18 = sadd.s32 4294967295, %s1400_s17   ;;  %s63_s19 = sadd.s32 1, %s1388_s14  ;;  %s1400_s17 = sphi %s1443_s17, %s18_s17   ;;  %s1396_s16 = sphi %s1441_s16, %s1701_s16   ;;  %s1392_s15 = sphi %s1439_s15, %s1700_s15   ;;  %s1388_s14 = sphi %s1437_s14, %s1699_s14   ;;  %s1384_s13 = sphi %s1435_s13, %s1698_s13   ;;  %s1380_s12 = sphi %s1433_s12, %s1697_s12  }
   0x6   : > { %p70_p0 = scmp.ne.s32.totalorder %s1388_s14, %s1384_s13  ;;  %p71_p1 = scmp.eq.s32.totalorder %s1400_s17, 0 }
   0x7   : > { %p76_p2 = scmp.ne.s32.totalorder %s1384_s13, %s1380_s12  ;;  %p1467_p3 = scmp.eq.s32.totalorder %s1056_s18, 0 }
   0x8   : > { %p72_p4 = por %p71_p1, %p70_p0  ;;  %p1057_p5 = scmp.ge.s32.totalorder %s1400_s17, 1 }
   0x9   : > { %s1688_s20 = scalar_select %p1467_p3, 1, 0 }
   0xa   : > { %p1474_p6 = por %p1467_p3, %p76_p2  ;;  %p139_p7 = scmp.lt.s32.totalorder %s1400_s17, 4 }
   0xb   : > { %s1402_s23 = smov [#allocation4]   ;;  %p1228_p10 = scmp.lt.s32.totalorder %s1400_s17, 3 }
   0xc   : > { %s1689_s21 = scalar_select %p1474_p6, 1, 0 }
   0xd   : > { %p1479_p8 = pnand %p1057_p5, %p139_p7  ;;  %s154_s24 = sshll.u32 %s1402_s23, 4  ;;  %s155_s24 = int_to_ptr.vmem [resolvable:$true] %s154_s24 }
   0xe   : > { %s165_s25 = sand.u32 1, %s1388_s14   ;;  %p1493_p12 = pnand %p1228_p10, %p72_p4 }
   0xf   : > { %s1690_s22 = scalar_select %p1479_p8, 1, 0 }
  0x10   : > { %p1219_p9 = pneg %p1479_p8  ;;  %s1288_s30 = scalar_lea.hbm %s1679_s0, 128 }
  0x11   : > { %s1692_s27 = scalar_select %p1493_p12, 1, 0 }
  0x12   : > { %p1489_p11 = pnand %p1219_p9, %p1467_p3  ;;  %p1289_p13 = scmp.ne.s32.totalorder %s1679_s0, %s1288_s30 }
  0x13   : > { %p1295_p5 = scmp.lt.u32.totalorder %s1288_s30, %s1679_s0 }
  0x14   : > { %p1290_p0 = pneg %p1489_p11 }
  0x16   : > { %p1291_p1 = pnand %p1290_p0, %p1289_p13 }
  0x18   : > { %p1292_p2 = pneg %p1291_p1 }
  0x1a   : > { %p1297_p4 = pnand %p1295_p5, %p1292_p2 }
  0x1c   : > { %1300 = shalt.err (!%p1297_p4)
}
  0x1d   : > { %s1301_s8 = scalar_lea.vmem %s155_s24, 128  ;;  %p1309_p6 = scmp.lt.s32.totalorder %s155_s24, %s155_s24 }
  0x1e   : > { %p1302_p7 = scmp.ne.s32.totalorder %s155_s24, %s1301_s8  ;;  %p1310_p3 = scmp.lt.s32.totalorder %s1301_s8, %s1301_s8 }
  0x20   : > { %p1304_p9 = pnand %p1302_p7, %p1290_p0  ;;  %p1311_p8 = por %p1310_p3, %p1309_p6 }
  0x22   : > { %p1305_p10 = pneg %p1304_p9 }
  0x24   : > { %p1312_p12 = pnand %p1311_p8, %p1305_p10 }
  0x26   : > { %1315 = shalt.err (!%p1312_p12)
}
  0x27   : > { %1222 = dma.hbm_to_vmem [thread:$0]  (!%p1489_p11), %s1679_s0, 128, %s155_s24, [#allocation5]  }
  0x28   : > { %s27_s11 = sadd.s32 1, %s1396_s16  ;;  %s1060_s12 = sshll.u32 %s165_s25, 5 }
  0x29   : > { %p28_p3 = scmp.ge.s32.totalorder %s27_s11, 3  ;;  %s1061_s18 = sshll.u32 %s1396_s16, 7 }
  0x2a   : > { %s169_s23 = scalar_lea.vmem [#allocation6], %s1060_s12  ;;  %s1522_s30 = scalar_lea.hbm %s1680_s1, %s1061_s18 }
  0x2b   : > { %s175_s26 = sshll.u32 %s169_s23, 4  ;;  %s1703_s11 = smov (%p28_p3, %s27_s11), 0  ;;  %s1524_s26 = int_to_ptr.vmem [resolvable:$true] %s175_s26 }
  0x2c   : > { %s60_s24 = ssub.s32 %s1396_s16, %s1703_s11  ;;  %s1535_s5 = scalar_lea.sflag [#allocation7], %s165_s25 }
  0x2d   : > { %p61_p6 = scmp.eq.s32.totalorder %s60_s24, 0  ;;  %s1316_s6 = scalar_lea.hbm %s1522_s30, 512 }
  0x2e   : > { %p1317_p8 = scmp.ne.s32.totalorder %s1522_s30, %s1316_s6  ;;  %p1693_p11 = scmp.ne.s32.totalorder %s1692_s27, 0 }
  0x2f   : > { %s1531_s4 = scalar_select %p61_p6, %s1388_s14, %s63_s19  }
  0x30   : > { %p1318_p12 = pneg %p1693_p11  ;;  %s1321_s9 = scalar_lea.hbm %s1680_s1, 1536 }
  0x31   : > { %p1322_p1 = scmp.lt.u32.totalorder %s1522_s30, %s1680_s1  ;;  %p1323_p2 = scmp.lt.u32.totalorder %s1321_s9, %s1316_s6 }
  0x32   : > { %p1319_p13 = pnand %p1318_p12, %p1317_p8  ;;  %p1325_p4 = scmp.lt.u32.totalorder %s1316_s6, %s1522_s30 }
  0x33   : > { %p1324_p5 = por %p1323_p2, %p1322_p1 }
  0x34   : > { %p1320_p0 = pneg %p1319_p13 }
  0x35   : > { %p1326_p7 = por %p1325_p4, %p1324_p5 }
  0x37   : > { %p1327_p9 = pnand %p1326_p7, %p1320_p0 }
  0x39   : > { %1330 = shalt.err (!%p1327_p9)
}
  0x3a   : > { %s1331_s19 = scalar_lea.vmem %s1524_s26, 512  ;;  %s1403_s25 = smov [#allocation6]  }
  0x3b   : > { %p1332_p10 = scmp.ne.s32.totalorder %s1524_s26, %s1331_s19  ;;  %s1336_s18 = sshll.u32 %s1403_s25, 4  ;;  %s1337_s18 = int_to_ptr.vmem [resolvable:$false] %s1336_s18 }
  0x3c   : > { %s1338_s23 = scalar_lea.vmem %s1337_s18, 1024  ;;  %p1339_p8 = scmp.lt.s32.totalorder %s1524_s26, %s1337_s18 }
  0x3d   : > { %p1334_p3 = pnand %p1332_p10, %p1318_p12  ;;  %p1340_p13 = scmp.lt.s32.totalorder %s1338_s23, %s1331_s19 }
  0x3f   : > { %p1335_p6 = pneg %p1334_p3  ;;  %p1341_p1 = por %p1340_p13, %p1339_p8 }
  0x41   : > { %p1342_p2 = pnand %p1341_p1, %p1335_p6 }
  0x43   : > { %1345 = shalt.err (!%p1342_p2)
}
  0x44   : > { %s1404_s28 = smov 384   ;;  %s1405_s29 = smov 128  }
  0x45   : > { %s1406_s24 = smov 8   ;;  %p1694_p12 = scmp.ne.s32.totalorder %s1690_s22, 0 }
  0x46   : > { %1226 = dma.hbm_to_vmem [thread:$0]  (!%p1693_p11), %s1522_s30, 512, %s1524_s26, %s1535_s5, %s1404_s28, %s1405_s29, %s1406_s24  }
  0x47   : > { %187 = sbr.rel (%p1694_p12) target bundleno = 3846 (0xf06), region = 28  ;;  %p1695_p0 = scmp.ne.s32.totalorder (!%p1694_p12), %s1688_s20, 0 }
  0x4e   : > { %1371 = dma.done.wait (%p1695_p0), [#allocation5], 128  }
  0x4f   : > { %1373 = vsyncadd (%p1695_p0), [#allocation5], 4294967168  ;;  %s193_s6 = sand.u32 1, %s1384_s13   ;;  %p1696_p5 = scmp.ne.s32.totalorder %s1689_s21, 0 }
  0x50   : > { %s1064_s7 = sshll.u32 %s193_s6, 5  ;;  %s194_s8 = scalar_lea.sflag [#allocation7], %s193_s6 }
  0x51   : > { %s197_s9 = scalar_lea.vmem [#allocation6], %s1064_s7 }
  0x52   : > { %1375 = dma.done.wait (%p1696_p5), %s194_s8, 512  }
  0x53   : > { %1377 = vsyncadd (%p1696_p5), %s194_s8, 4294966784  ;;  %p1065_p11 = scmp.ne.s32.totalorder %s1392_s15, 0 }
  0x54   : > { %vm235_vm0 = vcmask (!%p1065_p11), 31744   ;;  %v1407_v0 = vmov (!%p1065_p11), -inf   ;;  %v1408_v1 = vmov (!%p1065_p11), 1073741824  }
  0x55   : > { %234 = sbr.rel (%p1065_p11) target bundleno = 92 (0x5c), region = 40  ;;  %236 = vst.msk [vmem:[#allocation2] sm:$0xff] (!%p1065_p11), %vm235_vm0, %v1407_v0  ;;  %237 = vst.msk [vmem:[#allocation3] sm:$0xff] (!%p1065_p11), %vm235_vm0, %v1408_v1 }
  0x5c PF: > { %v239_v2 = vld [vmem:[%s197_s9] sm:$0xff]  ;;  %v240_v3 = vld [vmem:[%s197_s9 + $0x8] sm:$0xff]  ;;  %v241_v4 = vld [vmem:[%s197_s9 + $0x10] sm:$0xff]  ;;  %v1409_v5 = vmov 0.0|0.0   ;;  %vm243_vm1 = vcmask 261120   ;;  %vm1410_vm2 = vmmov 0   ;;  %v732_v43 = vlaneseq }
  0x5d   : > { %1168 = vmatprep.subr.bf16.mxu1 %v1409_v5  ;;  %1186 = vmatprep.subr.bf16.mxu0 %v1409_v5  ;;  %v248_v6 = vand.u32 4294901760, %v239_v2  ;;  %v251_v7 = vand.u32 4294901760, %v240_v3  ;;  %v242_v8 = vld [vmem:[%s197_s9 + $0x18] sm:$0xff]  ;;  %v254_v9 = vand.u32 4294901760, %v241_v4  ;;  %v1411_v12 = vmov 0.0   ;;  %s1066_s20 = sshll.u32 %s1392_s15, 7 }
  0x5e   : > { %v238_v10 = vld [vmem:[#allocation4] sm:$0xff]  ;;  %v257_v11 = vand.u32 4294901760, %v242_v8  ;;  %1110 = vmatprep.mubr.msk.f32.mxu1 %vm1410_vm2, %v1411_v12  ;;  %1143 = vmatprep.mubr.msk.f32.mxu0 %vm1410_vm2, %v1411_v12  ;;  %v1594_v44 = vand.u32 127, %v732_v43  ;;  %v1596_v45 = vstv %s1066_s20  ;;  %vm821_vm10 = vcmask 7168   ;;  %s1412_s21 = smov 4   ;;  %p1067_p4 = scmp.ne.s32.totalorder %s1392_s15, 2 }
  0x5f   : > { %v245_v13 = vsel %vm243_vm1, %v238_v10, 0  ;;  %v1169_v14 = vpack.c.bf16 %v251_v7, %v248_v6  ;;  %v328_v15 = vsub.f32 %v239_v2, %v248_v6  ;;  %v335_v16 = vsub.f32 %v240_v3, %v251_v7 }
  0x60   : > { %v342_v17 = vsub.f32 %v241_v4, %v254_v9  ;;  %v349_v18 = vsub.f32 %v242_v8, %v257_v11  ;;  %v316_v19 = vand.u32 4294901760, %v245_v13  ;;  %v1172_v20 = vpack.c.bf16 %v257_v11, %v254_v9 }
  0x61   : > { %1170 = vmatpush3.bf16.msra.mxu1 %v1169_v14  ;;  %1188 = vmatpush3.bf16.msra.mxu0 %v1169_v14  ;;  %v329_v21 = vand.u32 4294901760, %v328_v15  ;;  %v336_v22 = vand.u32 4294901760, %v335_v16  ;;  %v1181_v41 = vpack.c.bf16 %v335_v16, %v328_v15  ;;  %v736_v46 = vadd.s32 %v1596_v45, %v1594_v44 }
  0x62   : > { %v343_v23 = vand.u32 4294901760, %v342_v17  ;;  %1171 = vmatprep.subr.bf16.mxu1 %v1409_v5  ;;  %1189 = vmatprep.subr.bf16.mxu0 %v1409_v5  ;;  %v317_v24 = vsub.f32 %v245_v13, %v316_v19  ;;  %v350_v25 = vand.u32 4294901760, %v349_v18  ;;  %v1184_v42 = vpack.c.bf16 %v349_v18, %v342_v17 }
  0x63   : > { %v330_v26 = vsub.f32 %v328_v15, %v329_v21  ;;  %v337_v27 = vsub.f32 %v335_v16, %v336_v22  ;;  %v1193_v33 = vpack.c.bf16 %v336_v22, %v329_v21  ;;  %vm737_vm3 = vcmp.lt.s32.totalorder %v736_v46, 300 }
  0x64   : > { %v344_v28 = vsub.f32 %v342_v17, %v343_v23  ;;  %v318_v29 = vand.u32 4294901760, %v317_v24  ;;  %v351_v30 = vsub.f32 %v349_v18, %v350_v25  ;;  %v1196_v39 = vpack.c.bf16 %v350_v25, %v343_v23 }
  0x65   : > { %1173 = vmatpush3.bf16.msra.mxu1 %v1172_v20  ;;  %1191 = vmatpush3.bf16.msra.mxu0 %v1172_v20  ;;  %v331_v31 = vand.u32 4294901760, %v330_v26  ;;  %v338_v32 = vand.u32 4294901760, %v337_v27  ;;  %vm823_vm14 = vcmask 15360   ;;  %vm825_vm0 = vcmask 23552  }
  0x66   : > { %v319_v34 = vsub.f32 %v317_v24, %v318_v29  ;;  %1174 = vmatprep.subr.bf16.mxu1 %v1409_v5  ;;  %1192 = vmatprep.subr.bf16.mxu0 %v1409_v5  ;;  %v345_v36 = vand.u32 4294901760, %v344_v28  ;;  %v352_v37 = vand.u32 4294901760, %v351_v30 }
  0x67   : > { %v1175_v35 = vpack.c.bf16 %v338_v32, %v331_v31 }
  0x68   : > { %v320_v38 = vand.u32 4294901760, %v319_v34  ;;  %1144 = vmatmul.mubr.f32.vlgmr.msra.gmra.mrb[0].mxu0 %v318_v29  ;;  %v1178_v40 = vpack.c.bf16 %v352_v37, %v345_v36 }
  0x69   : > { %1194 = vmatpush3.bf16.msra.mxu0 %v1193_v33  ;;  %1154 = vmatprep.mubr.msk.f32.mxu0 %vm1410_vm2, %v1411_v12 }
  0x6a   : > { %1111 = vmatmul.mubr.f32.vlgmr.msra.gmra.mrb[0].mxu1 %v320_v38  ;;  %1195 = vmatprep.subr.bf16.mxu0 %v1409_v5 }
  0x6b   : > { %1176 = vmatpush3.bf16.msra.mxu1 %v1175_v35  ;;  %1121 = vmatprep.mubr.msk.f32.mxu1 %vm1410_vm2, %v1411_v12 }
  0x6c   : > { %1177 = vmatprep.subr.bf16.mxu1 %v1409_v5 }
  0x6d   : > { %1197 = vmatpush3.bf16.msra.mxu0 %v1196_v39 }
  0x6e   : > { %1198 = vmatprep.subr.bf16.mxu0 %v1409_v5 }
  0x6f   : > { %1179 = vmatpush3.bf16.msra.mxu1 %v1178_v40 }
  0x70   : > { %1180 = vmatprep.subr.bf16.mxu1 %v1409_v5  ;;  %1155 = vmatmul.mubr.f32.vlgmr.msra.gmra.mrb[0].mxu0 %v316_v19 }
  0x71   : > { %1200 = vmatpush3.bf16.msra.mxu0 %v1169_v14  ;;  %1165 = vmatprep.mubr.msk.f32.mxu0 %vm1410_vm2, %v1411_v12 }
  0x72   : > { %1122 = vmatmul.mubr.f32.vlgmr.msra.gmra.mrb[0].mxu1 %v316_v19  ;;  %1201 = vmatprep.subr.bf16.mxu0 %v1409_v5 }
  0x73   : > { %1182 = vmatpush3.bf16.msra.mxu1 %v1181_v41  ;;  %1132 = vmatprep.mubr.msk.f32.mxu1 %vm1410_vm2, %v1411_v12  ;;  %vm835_vm2 = vcmask 31744  }
  0x74   : > { %1183 = vmatprep.subr.bf16.mxu1 %v1409_v5 }
  0x75   : > { %1203 = vmatpush3.bf16.msra.mxu0 %v1172_v20 }
  0x77   : > { %1185 = vmatpush3.bf16.msra.mxu1 %v1184_v42 }
  0x78   : > { %1166 = vmatmul.mubr.f32.vlgmr.msra.gmra.mrb[0].mxu0 %v316_v19 }
  0x7a   : > { %1133 = vmatmul.mubr.f32.vlgmr.msra.gmra.mrb[0].mxu1 %v317_v24 }
 0x14b   : > { %v728_v47 = vpop.f32.mrb[0].mxu0 }
 0x14c   : > { %v1167_v48 = vpop.f32.mrb[1].mxu0 }
 0x14d   : > { %v493_v49 = vpop.f32.mrb[0].mxu1 }
 0x14e   : > { %v1204_v50 = vadd.f32 %v728_v47, %v493_v49  ;;  %v1134_v51 = vpop.f32.mrb[1].mxu1  ;;  %v830_v49 = vld [vmem:[#allocation2] sm:$0xff] }
 0x150   : > { %v738_v52 = vsel %vm737_vm3, %v1204_v50, -inf  ;;  %vm841_vm3 = vcmask 64512  }
 0x151   : > { %739 = vmax.xlane.f32.xlu0 %v738_v52 }
 0x1de   : > { %v1600_v53 = vpop.xlane.xlu0 %739 }
 0x1df   : > { %vm741_vm4 = vcmp.eq.f32.partialorder %v738_v52, %v1600_v53 }
 0x1e0   : > { %v742_v54 = vsel %vm741_vm4, %v1594_v44, 128 }
 0x1e1   : > { %v744_v55 = vshra.s32 %v742_v54, 16  ;;  %v743_v57 = vand.u32 65535, %v742_v54 }
 0x1e3   : > { %v746_v56 = vcvt.s32.f32 %v744_v55  ;;  %v745_v59 = vcvt.s32.f32 %v743_v57 }
 0x1e5   : > { %747 = vmin.xlane.f32.xlu0 %v746_v56 }
 0x272   : > { %v748_v58 = vpop.xlane.xlu0 %747 }
 0x273   : > { %vm749_vm5 = vcmp.eq.f32.partialorder %v746_v56, %v748_v58  ;;  %v754_v61 = vcvt.f32.s32 %v748_v58 }
 0x274   : > { %v750_v60 = vsel %vm749_vm5, %v745_v59, inf }
 0x275   : > { %751 = vmin.xlane.f32.xlu1 %v750_v60  ;;  %v755_v63 = vshll.u32 %v754_v61, 16  ;;  %v837_v60 = vld [vmem:[#allocation3] sm:$0xff] }
 0x302   : > { %v752_v62 = vpop.xlane.xlu1 %751 }
 0x303   : > { %v753_v0 = vcvt.f32.s32 %v752_v62 }
 0x305   : > { %v756_v1 = vadd.s32 %v755_v63, %v753_v0 }
 0x307   : > { %vm758_vm6 = vcmp.eq.s32.totalorder %v1594_v44, %v756_v1  ;;  %v757_v16 = vadd.s32 %v756_v1, %v1596_v45 }
 0x308   : > { %v759_v2 = vsel %vm758_vm6, -inf, %v738_v52 }
 0x309   : > { %760 = vmax.xlane.f32.xlu1 %v759_v2 }
 0x396   : > { %v761_v3 = vpop.xlane.xlu1 %760 }
 0x397   : > { %vm762_vm7 = vcmp.eq.f32.partialorder %v759_v2, %v761_v3  ;;  %v822_v40 = vsel %vm821_vm10, %v1600_v53, %v761_v3 }
 0x398   : > { %v763_v4 = vsel %vm762_vm7, %v1594_v44, 128 }
 0x399   : > { %v765_v5 = vshra.s32 %v763_v4, 16  ;;  %v764_v7 = vand.u32 65535, %v763_v4 }
 0x39b   : > { %v767_v6 = vcvt.s32.f32 %v765_v5  ;;  %v766_v9 = vcvt.s32.f32 %v764_v7 }
 0x39d   : > { %768 = vmin.xlane.f32.xlu0 %v767_v6 }
 0x42a   : > { %v769_v8 = vpop.xlane.xlu0 %768 }
 0x42b   : > { %vm770_vm8 = vcmp.eq.f32.partialorder %v767_v6, %v769_v8  ;;  %v775_v11 = vcvt.f32.s32 %v769_v8 }
 0x42c   : > { %v771_v10 = vsel %vm770_vm8, %v766_v9, inf }
 0x42d   : > { %772 = vmin.xlane.f32.xlu1 %v771_v10  ;;  %v776_v13 = vshll.u32 %v775_v11, 16 }
 0x4ba   : > { %v773_v12 = vpop.xlane.xlu1 %772 }
 0x4bb   : > { %v774_v14 = vcvt.f32.s32 %v773_v12 }
 0x4bd   : > { %v777_v15 = vadd.s32 %v776_v13, %v774_v14 }
 0x4bf   : > { %v778_v17 = vadd.s32 %v777_v15, %v1596_v45  ;;  %vm779_vm9 = vcmp.eq.s32.totalorder %v1594_v44, %v777_v15 }
 0x4c0   : > { %v780_v18 = vsel %vm779_vm9, -inf, %v759_v2 }
 0x4c1   : > { %781 = vmax.xlane.f32.xlu0 %v780_v18  ;;  %v827_v19 = vsel %vm821_vm10, %v757_v16, %v778_v17 }
 0x54e   : > { %v782_v20 = vpop.xlane.xlu0 %781 }
 0x54f   : > { %vm783_vm11 = vcmp.eq.f32.partialorder %v780_v18, %v782_v20  ;;  %v824_v41 = vsel %vm823_vm14, %v822_v40, %v782_v20 }
 0x550   : > { %v784_v21 = vsel %vm783_vm11, %v1594_v44, 128 }
 0x551   : > { %v786_v22 = vshra.s32 %v784_v21, 16  ;;  %v785_v24 = vand.u32 65535, %v784_v21 }
 0x553   : > { %v788_v23 = vcvt.s32.f32 %v786_v22  ;;  %v787_v26 = vcvt.s32.f32 %v785_v24 }
 0x555   : > { %789 = vmin.xlane.f32.xlu1 %v788_v23 }
 0x5e2   : > { %v790_v25 = vpop.xlane.xlu1 %789 }
 0x5e3   : > { %vm791_vm12 = vcmp.eq.f32.partialorder %v788_v23, %v790_v25  ;;  %v796_v28 = vcvt.f32.s32 %v790_v25 }
 0x5e4   : > { %v792_v27 = vsel %vm791_vm12, %v787_v26, inf }
 0x5e5   : > { %793 = vmin.xlane.f32.xlu0 %v792_v27  ;;  %v797_v30 = vshll.u32 %v796_v28, 16 }
 0x672   : > { %v794_v29 = vpop.xlane.xlu0 %793 }
 0x673   : > { %v795_v31 = vcvt.f32.s32 %v794_v29 }
 0x675   : > { %v798_v32 = vadd.s32 %v797_v30, %v795_v31 }
 0x677   : > { %v799_v33 = vadd.s32 %v798_v32, %v1596_v45  ;;  %vm800_vm13 = vcmp.eq.s32.totalorder %v1594_v44, %v798_v32 }
 0x678   : > { %v801_v34 = vsel %vm800_vm13, -inf, %v780_v18 }
 0x679   : > { %802 = vmax.xlane.f32.xlu1 %v801_v34  ;;  %v828_v35 = vsel %vm823_vm14, %v827_v19, %v799_v33 }
 0x706   : > { %v803_v36 = vpop.xlane.xlu1 %802 }
 0x707   : > { %vm804_vm15 = vcmp.eq.f32.partialorder %v801_v34, %v803_v36  ;;  %v826_v42 = vsel %vm825_vm0, %v824_v41, %v803_v36 }
 0x708   : > { %v805_v37 = vsel %vm804_vm15, %v1594_v44, 128 }
 0x709   : > { %v807_v38 = vshra.s32 %v805_v37, 16  ;;  %v806_v43 = vand.u32 65535, %v805_v37 }
 0x70b   : > { %v809_v39 = vcvt.s32.f32 %v807_v38  ;;  %v808_v47 = vcvt.s32.f32 %v806_v43 }
 0x70d   : > { %810 = vmin.xlane.f32.xlu0 %v809_v39 }
 0x723   : > { %832 = vrot.lane.b32.xlu0 %v826_v42, %s1412_s21 }
 0x79a   : > { %v811_v46 = vpop.xlane.xlu0 %810 }
 0x79b   : > { %vm812_vm1 = vcmp.eq.f32.partialorder %v809_v39, %v811_v46  ;;  %v817_v52 = vcvt.f32.s32 %v811_v46 }
 0x79c   : > { %v813_v48 = vsel %vm812_vm1, %v808_v47, inf }
 0x79d   : > { %814 = vmin.xlane.f32.xlu1 %v813_v48  ;;  %v818_v54 = vshll.u32 %v817_v52, 16 }
 0x79e   : > { %v833_v44 = vpop.permute.xlu0 %832 }
 0x79f   : > { %v836_v50 = vsel %vm835_vm2, %v830_v49, %v833_v44 }
 0x7a0   : > { %v842_v51 = vsel %vm841_vm3, %v836_v50, -inf }
 0x7a1   : > { %843 = vmax.xlane.f32.xlu1 %v842_v51 }
 0x82a   : > { %v815_v53 = vpop.xlane.xlu1 %814 }
 0x82b   : > { %v816_v55 = vcvt.f32.s32 %v815_v53 }
 0x82d   : > { %v819_v56 = vadd.s32 %v818_v54, %v816_v55 }
 0x82e   : > { %v1623_v59 = vpop.xlane.xlu1 %843 }
 0x82f   : > { %v820_v57 = vadd.s32 %v819_v56, %v1596_v45  ;;  %vm845_vm4 = vcmp.eq.f32.partialorder %v836_v50, %v1623_v59 }
 0x831   : > { %v829_v58 = vsel %vm825_vm0, %v828_v35, %v820_v57 }
 0x832   : > { %838 = vrot.lane.b32.xlu1 %v829_v58, %s1412_s21 }
 0x8a4   : > { %v839_v61 = vpop.permute.xlu1 %838 }
 0x8a5   : > { %v1627_v62 = vsel %vm835_vm2, %v837_v60, %v839_v61 }
 0x8a6   : > { %v846_v63 = vsel %vm845_vm4, %v1627_v62, 1073741824 }
 0x8a7   : > { %v847_v0 = vsel %vm841_vm3, %v846_v63, 2147483647 }
 0x8a8   : > { %v849_v1 = vshra.s32 %v847_v0, 16  ;;  %v848_v45 = vand.u32 65535, %v847_v0 }
 0x8aa   : > { %v851_v2 = vcvt.s32.f32 %v849_v1  ;;  %v850_v4 = vcvt.s32.f32 %v848_v45 }
 0x8ac   : > { %852 = vmin.xlane.f32.xlu1 %v851_v2 }
 0x939   : > { %v853_v3 = vpop.xlane.xlu1 %852 }
 0x93a   : > { %vm854_vm5 = vcmp.eq.f32.partialorder %v851_v2, %v853_v3  ;;  %v859_v6 = vcvt.f32.s32 %v853_v3 }
 0x93b   : > { %v855_v5 = vsel %vm854_vm5, %v850_v4, inf }
 0x93c   : > { %856 = vmin.xlane.f32.xlu0 %v855_v5  ;;  %v860_v8 = vshll.u32 %v859_v6, 16 }
 0x9c9   : > { %v857_v7 = vpop.xlane.xlu0 %856 }
 0x9ca   : > { %v858_v9 = vcvt.f32.s32 %v857_v7 }
 0x9cc   : > { %v861_v10 = vadd.s32 %v860_v8, %v858_v9 }
 0x9ce   : > { %vm862_vm6 = vcmp.eq.s32.totalorder %v1627_v62, %v861_v10 }
 0x9cf   : > { %v863_v11 = vsel %vm862_vm6, -inf, %v836_v50 }
 0x9d0   : > { %v864_v12 = vsel %vm841_vm3, %v863_v11, -inf }
 0x9d1   : > { %865 = vmax.xlane.f32.xlu0 %v864_v12 }
 0xa5e   : > { %v866_v13 = vpop.xlane.xlu0 %865 }
 0xa5f   : > { %vm867_vm7 = vcmp.eq.f32.partialorder %v863_v11, %v866_v13  ;;  %v928_v49 = vsel %vm821_vm10, %v1623_v59, %v866_v13 }
 0xa60   : > { %v868_v14 = vsel %vm867_vm7, %v1627_v62, 1073741824 }
 0xa61   : > { %v869_v15 = vsel %vm841_vm3, %v868_v14, 2147483647 }
 0xa62   : > { %v871_v16 = vshra.s32 %v869_v15, 16  ;;  %v870_v18 = vand.u32 65535, %v869_v15 }
 0xa64   : > { %v873_v17 = vcvt.s32.f32 %v871_v16  ;;  %v872_v20 = vcvt.s32.f32 %v870_v18 }
 0xa66   : > { %874 = vmin.xlane.f32.xlu0 %v873_v17 }
 0xaf3   : > { %v875_v19 = vpop.xlane.xlu0 %874 }
 0xaf4   : > { %vm876_vm8 = vcmp.eq.f32.partialorder %v873_v17, %v875_v19  ;;  %v881_v22 = vcvt.f32.s32 %v875_v19 }
 0xaf5   : > { %v877_v21 = vsel %vm876_vm8, %v872_v20, inf }
 0xaf6   : > { %878 = vmin.xlane.f32.xlu1 %v877_v21  ;;  %v882_v24 = vshll.u32 %v881_v22, 16 }
 0xb83   : > { %v879_v23 = vpop.xlane.xlu1 %878 }
 0xb84   : > { %v880_v25 = vcvt.f32.s32 %v879_v23 }
 0xb86   : > { %v883_v26 = vadd.s32 %v882_v24, %v880_v25 }
 0xb88   : > { %vm884_vm9 = vcmp.eq.s32.totalorder %v1627_v62, %v883_v26  ;;  %v932_v43 = vsel %vm821_vm10, %v861_v10, %v883_v26 }
 0xb89   : > { %v885_v27 = vsel %vm884_vm9, -inf, %v863_v11 }
 0xb8a   : > { %v886_v28 = vsel %vm841_vm3, %v885_v27, -inf }
 0xb8b   : > { %887 = vmax.xlane.f32.xlu0 %v886_v28 }
 0xc18   : > { %v888_v29 = vpop.xlane.xlu0 %887 }
 0xc19   : > { %vm889_vm11 = vcmp.eq.f32.partialorder %v885_v27, %v888_v29  ;;  %v929_v44 = vsel %vm823_vm14, %v928_v49, %v888_v29 }
 0xc1a   : > { %v890_v30 = vsel %vm889_vm11, %v1627_v62, 1073741824 }
 0xc1b   : > { %v891_v31 = vsel %vm841_vm3, %v890_v30, 2147483647 }
 0xc1c   : > { %v893_v32 = vshra.s32 %v891_v31, 16  ;;  %v892_v34 = vand.u32 65535, %v891_v31 }
 0xc1e   : > { %v895_v33 = vcvt.s32.f32 %v893_v32  ;;  %v894_v36 = vcvt.s32.f32 %v892_v34 }
 0xc20   : > { %896 = vmin.xlane.f32.xlu1 %v895_v33 }
 0xcad   : > { %v897_v35 = vpop.xlane.xlu1 %896 }
 0xcae   : > { %vm898_vm12 = vcmp.eq.f32.partialorder %v895_v33, %v897_v35  ;;  %v903_v38 = vcvt.f32.s32 %v897_v35 }
 0xcaf   : > { %v899_v37 = vsel %vm898_vm12, %v894_v36, inf }
 0xcb0   : > { %900 = vmin.xlane.f32.xlu0 %v899_v37  ;;  %v904_v40 = vshll.u32 %v903_v38, 16 }
 0xd3d   : > { %v901_v39 = vpop.xlane.xlu0 %900 }
 0xd3e   : > { %v902_v41 = vcvt.f32.s32 %v901_v39 }
 0xd40   : > { %v905_v42 = vadd.s32 %v904_v40, %v902_v41 }
 0xd42   : > { %v933_v46 = vsel %vm823_vm14, %v932_v43, %v905_v42  ;;  %vm906_vm13 = vcmp.eq.s32.totalorder %v1627_v62, %v905_v42 }
 0xd43   : > { %v907_v47 = vsel %vm906_vm13, -inf, %v885_v27 }
 0xd44   : > { %v908_v48 = vsel %vm841_vm3, %v907_v47, -inf }
 0xd45   : > { %909 = vmax.xlane.f32.xlu1 %v908_v48 }
 0xdd2   : > { %v910_v50 = vpop.xlane.xlu1 %909 }
 0xdd3   : > { %vm911_vm15 = vcmp.eq.f32.partialorder %v907_v47, %v910_v50  ;;  %v930_v51 = vsel %vm825_vm0, %v929_v44, %v910_v50 }
 0xdd4   : > { %v912_v52 = vsel %vm911_vm15, %v1627_v62, 1073741824  ;;  %931 = vst.msk [vmem:[#allocation2] sm:$0xff] %vm835_vm2, %v930_v51 }
 0xdd5   : > { %v913_v53 = vsel %vm841_vm3, %v912_v52, 2147483647 }
 0xdd6   : > { %v915_v54 = vshra.s32 %v913_v53, 16  ;;  %v914_v56 = vand.u32 65535, %v913_v53 }
 0xdd8   : > { %v917_v55 = vcvt.s32.f32 %v915_v54  ;;  %v916_v58 = vcvt.s32.f32 %v914_v56 }
 0xdda   : > { %918 = vmin.xlane.f32.xlu0 %v917_v55 }
 0xddb   : > { %v940_v2 = vld [vmem:[#allocation2] sm:$0xff] (!%p1067_p4) }
 0xddc   : > { %941 = vst.msk [vmem:[%s1681_s2] sm:$0xff] (!%p1067_p4), %vm835_vm2, %v940_v2 }
 0xe67   : > { %v919_v57 = vpop.xlane.xlu0 %918 }
 0xe68   : > { %vm920_vm1 = vcmp.eq.f32.partialorder %v917_v55, %v919_v57  ;;  %v925_v60 = vcvt.f32.s32 %v919_v57 }
 0xe69   : > { %v921_v59 = vsel %vm920_vm1, %v916_v58, inf }
 0xe6a   : > { %922 = vmin.xlane.f32.xlu1 %v921_v59  ;;  %v926_v63 = vshll.u32 %v925_v60, 16 }
 0xef7   : > { %v923_v61 = vpop.xlane.xlu1 %922  ;;  %939 = sbr.rel (%p1067_p4) target bundleno = 3846 (0xf06), region = 44 }
 0xef8   : > { %v924_v0 = vcvt.f32.s32 %v923_v61 }
 0xefa   : > { %v927_v1 = vadd.s32 %v926_v63, %v924_v0 }
 0xefc   : > { %v934_v62 = vsel %vm825_vm0, %v933_v46, %v927_v1 }
 0xefd   : > { %935 = vst.msk [vmem:[#allocation3] sm:$0xff] %vm835_vm2, %v934_v62 }
 0xf04   : > { %v942_v45 = vld [vmem:[#allocation3] sm:$0xff] }
 0xf05   : > { %943 = vst.msk [vmem:[%s1682_s3] sm:$0xff] %vm835_vm2, %v942_v45 }
 0xf06 PF: > { %s18_s17 = sadd.s32 1, %s1400_s17   ;;  %s1697_s12 = smov %s1384_s13 }
 0xf07   : > { %p15_p7 = scmp.ge.s32.totalorder %s18_s17, 5   ;;  %s1698_s13 = smov %s1388_s14 }
 0xf08   : > { %s1699_s14 = smov %s1531_s4  ;;  %s1700_s15 = smov %s1396_s16 }
 0xf09   : > { %s1701_s16 = smov %s1703_s11  ;;  %17 = sbr.rel (!%p15_p7) target bundleno = 5 (0x5), region = 94 }
 0xf10   :  { %977 = vsyncpa [#allocation5], 1 }
 0xf11   :  { %979 = vsyncpa [#allocation5 + $0x1], 1 }
 0xf12   :  { %980 = vsyncpa [#allocation7], 1 }
 0xf13   :  { %982 = vsyncpa [#allocation7 + $0x1], 1 }

</bundles_post_ra>
